<compile_context>
chip_gen: v7x
topology: tpu7x:2x2x1
jax: 0.10.0
libtpu: 0.0.40
codegen_flags: <defaults>
</compile_context>

<pallas_src>
import math

import jax
import jax.numpy as jnp
from jax.experimental import pallas as pl
from jax.experimental.pallas import tpu as pltpu


def masked_attention_head_kernel(x_ref, wqkv_ref, bias_ref, o_ref):
    # x_ref: (block_b, T, C); wqkv_ref: (C, 3*Hp); bias_ref: (T, T) f32
    # o_ref: (block_b, T, H)
    block_b, T, C = x_ref.shape
    H = o_ref.shape[-1]
    Hp = wqkv_ref.shape[-1] // 3

    x = x_ref[...]                       # native dtype, no upcast
    in_dtype = x.dtype

    # Fused, lane-padded QKV projection: (block_b*T, C) @ (C, 3*Hp), f32 acc.
    x2 = x.reshape(block_b * T, C)
    qkv = jnp.dot(x2, wqkv_ref[...],
                  preferred_element_type=jnp.float32)            # (bT, 3Hp)

    # Slices at 128-lane-aligned boundaries (cheap, no cross-lane movement).
    q = qkv[:, 0 * Hp:1 * Hp].astype(in_dtype).reshape(block_b, T, Hp)
    k = qkv[:, 1 * Hp:2 * Hp].astype(in_dtype).reshape(block_b, T, Hp)
    v = qkv[:, 2 * Hp:3 * Hp].astype(in_dtype).reshape(block_b, T, Hp)

    # Scores: batched q @ k^T (scale already baked into W_q). Padded lanes of
    # q/k are zero, so they contribute nothing to the contraction.
    s = jnp.einsum("bqh,bkh->bqk", q, k,
                   preferred_element_type=jnp.float32)            # (b, T, T) f32

    # Additive causal bias (0 kept / -1e30 masked) BEFORE the row max, so the
    # max is over kept entries only; masked exp is exactly 0 and the
    # denominator is >= 1 (diagonal is always kept) — no underflow/Inf path.
    s = s + bias_ref[...]

    s_max = jnp.max(s, axis=-1, keepdims=True)
    p = jnp.exp(s - s_max)
    denom = jnp.sum(p, axis=-1, keepdims=True)
    p = p * pl.reciprocal(denom, approx=True)                     # EUP divide

    # dropout(p=0.0) is the identity.

    out = jnp.einsum("bqk,bkh->bqh", p.astype(in_dtype), v,
                     preferred_element_type=jnp.float32)          # (b, T, Hp)
    o_ref[...] = out[..., :H].astype(o_ref.dtype)


def _choose_block_b(B, T, C, H, Hp, itemsize, budget_bytes):
    """Largest divisor of B that (a) leaves grid length >= 2 when B >= 2 (so
    both TCs on dual-core chips get work) and (b) fits the per-step VMEM
    working-set budget (double-buffered blocks + f32 intermediates)."""
    f32 = 4

    def step_bytes(bb):
        x_blk = bb * T * C * itemsize
        out_blk = bb * T * H * itemsize
        w_blk = C * 3 * Hp * itemsize
        bias_blk = T * T * f32
        pipelined = 2 * (x_blk + out_blk + w_blk + bias_blk)   # double-buffered
        interm = bb * T * 3 * Hp * f32           # qkv (f32 acc)
        interm += 3 * bb * T * Hp * itemsize     # q, k, v (native dtype)
        interm += 2 * bb * T * T * f32           # scores s and probs p
        interm += bb * T * Hp * f32              # padded out accumulator
        return pipelined + interm

    cap = max(1, B // 2)
    best = 1
    for bb in range(1, cap + 1):
        if B % bb == 0 and step_bytes(bb) <= budget_bytes:
            best = bb
    return best


def masked_attention_head(x, w_query, w_key, w_value, *, block_b=None,
                          vmem_limit_bytes=32 * 1024 * 1024):
    """x: (B, T, C); w_*: (C, H). Returns (B, T, H)."""
    B, T, C = x.shape
    H = w_query.shape[-1]
    Hp = ((H + 127) // 128) * 128          # 128-lane-aligned per-head slot
    dt = x.dtype

    # Bake the attention scale into W_q; zero-pad each weight to Hp lanes and
    # fuse into one (C, 3*Hp) matrix so the projection is a single matmul.
    scale = jnp.asarray(H ** (-0.5), dtype=w_query.dtype)

    def pad_lanes(w):
        return jnp.pad(w, ((0, 0), (0, Hp - H)))

    w_qkv = jnp.concatenate(
        [pad_lanes(w_query * scale), pad_lanes(w_key), pad_lanes(w_value)],
        axis=-1).astype(dt)                # (C, 3*Hp)

    # Precomputed additive causal bias, grid-invariant input (constant index
    # map) — mask construction is hoisted out of the per-step kernel body.
    causal = jnp.tril(jnp.ones((T, T), dtype=bool))
    bias = jnp.where(causal, 0.0, -1e30).astype(jnp.float32)      # (T, T)

    if block_b is None:
        budget = (vmem_limit_bytes * 3) // 4   # leave headroom vs scoped limit
        block_b = _choose_block_b(B, T, C, H, Hp, jnp.dtype(dt).itemsize,
                                  budget)
    assert B % block_b == 0
    grid = (B // block_b,)

    return pl.pallas_call(
        masked_attention_head_kernel,
        out_shape=jax.ShapeDtypeStruct((B, T, H), dt),
        grid_spec=pltpu.PrefetchScalarGridSpec(
            num_scalar_prefetch=0,
            grid=grid,
            in_specs=[
                pl.BlockSpec((block_b, T, C), lambda b: (b, 0, 0)),
                # Grid-invariant fused weight / causal bias: constant index map.
                pl.BlockSpec((C, 3 * Hp), lambda b: (0, 0)),
                pl.BlockSpec((T, T), lambda b: (0, 0)),
            ],
            out_specs=pl.BlockSpec((block_b, T, H), lambda b: (b, 0, 0)),
        ),
        compiler_params=pltpu.CompilerParams(
            dimension_semantics=("parallel",),
            vmem_limit_bytes=vmem_limit_bytes,
        ),
    )(x, w_qkv, bias)


def reference(x, w_query, w_key, w_value):
    """Pure-JAX reference mirroring the PyTorch forward."""
    q = x @ w_query
    k = x @ w_key
    v = x @ w_value
    wei = jnp.einsum("btd,bsd->bts", q, k) * (k.shape[-1] ** -0.5)
    T = x.shape[1]
    tril = jnp.tril(jnp.ones((T, T), dtype=bool))
    wei = jnp.where(tril, wei, -jnp.inf)
    wei = jax.nn.softmax(wei, axis=-1)
    return wei @ v


if __name__ == "__main__":
    # Small shapes consistent with the module: n_embd=32, head_size=16,
    # batch=2, seq=8 (<= block_size=128 so the causal mask applies to T).
    B, T, C, H = 2, 8, 32, 16

    key = jax.random.PRNGKey(0)
    kx, kq, kk, kv = jax.random.split(key, 4)

    x = jax.random.normal(kx, (B, T, C), dtype=jnp.float32)
    # Deterministic parameter init (Kaiming-uniform-like bound 1/sqrt(fan_in)),
    # stored as (n_embd, head_size) so that projection is x @ W.
    bound = 1.0 / math.sqrt(C)
    w_query = jax.random.uniform(kq, (C, H), jnp.float32, -bound, bound)
    w_key = jax.random.uniform(kk, (C, H), jnp.float32, -bound, bound)
    w_value = jax.random.uniform(kv, (C, H), jnp.float32, -bound, bound)

    out = masked_attention_head(x, w_query, w_key, w_value)
    out = jax.block_until_ready(out)

    ref = reference(x, w_query, w_key, w_value)
    assert out.shape == (B, T, H)
    # Tolerance accounts for pl.reciprocal(approx=True) in the softmax divide.
    assert jnp.allclose(out, ref, atol=5e-3, rtol=5e-3), (
        f"max abs err = {jnp.max(jnp.abs(out - ref))}"
    )

    print("KERNEL_OK")
</pallas_src>

<mosaic_0001>
module attributes {stable_mosaic.version = 11 : i64} {
  func.func @masked_attention_head_kernel(%arg0: i32, %arg1: memref<1x8x32xf32, #tpu.memory_space<vmem>>, %arg2: memref<32x384xf32, #tpu.memory_space<vmem>>, %arg3: memref<8x8xf32, #tpu.memory_space<vmem>>, %arg4: memref<1x8x16xf32, #tpu.memory_space<vmem>>) attributes {dimension_semantics = [#tpu.dimension_semantics<parallel>], iteration_bounds = array<i64: 2>, scalar_prefetch = 0 : i64, scratch_operands = 0 : i64, tpu.core_type = #tpu.core_type<tc>, window_params = [{transform_indices = @transform_0, window_bounds = array<i64: 1, 8, 32>}, {pipeline_mode = #tpu.pipeline_mode<synchronous>, transform_indices = @transform_1, window_bounds = array<i64: 32, 384>}, {pipeline_mode = #tpu.pipeline_mode<synchronous>, transform_indices = @transform_2, window_bounds = array<i64: 8, 8>}, {transform_indices = @transform_3, window_bounds = array<i64: 1, 8, 16>}]} {
    %c0 = arith.constant 0 : index
    %c0_0 = arith.constant 0 : index
    %c0_1 = arith.constant 0 : index
    %0 = vector.load %arg1[%c0, %c0_0, %c0_1] : memref<1x8x32xf32, #tpu.memory_space<vmem>>, vector<1x8x32xf32>
    %1 = vector.shape_cast %0 : vector<1x8x32xf32> to vector<8x32xf32>
    %c0_2 = arith.constant 0 : index
    %c0_3 = arith.constant 0 : index
    %2 = vector.load %arg2[%c0_2, %c0_3] : memref<32x384xf32, #tpu.memory_space<vmem>>, vector<32x384xf32>
    %cst = arith.constant dense<0.000000e+00> : vector<8x384xf32>
    %3 = tpu.matmul %1, %2, %cst {dimension_numbers = #tpu.dot_dimension_numbers<[1], [0], [0], [1], [0, 0, 1, 1], [], []>} : vector<8x32xf32>, vector<32x384xf32>, vector<8x384xf32> -> vector<8x384xf32>
    %4 = vector.extract_strided_slice %3 {offsets = [0, 0], sizes = [8, 128], strides = [1, 1]} : vector<8x384xf32> to vector<8x128xf32>
    %5 = vector.shape_cast %4 : vector<8x128xf32> to vector<1x8x128xf32>
    %6 = vector.extract_strided_slice %3 {offsets = [0, 128], sizes = [8, 128], strides = [1, 1]} : vector<8x384xf32> to vector<8x128xf32>
    %7 = vector.shape_cast %6 : vector<8x128xf32> to vector<1x8x128xf32>
    %8 = vector.extract_strided_slice %3 {offsets = [0, 256], sizes = [8, 128], strides = [1, 1]} : vector<8x384xf32> to vector<8x128xf32>
    %9 = vector.shape_cast %8 : vector<8x128xf32> to vector<1x8x128xf32>
    "tpu.trace_start"() <{level = 10 : i32, message = "bqh,bkh->bqk"}> : () -> ()
    %cst_4 = arith.constant dense<0.000000e+00> : vector<1x8x8xf32>
    %10 = tpu.matmul %5, %7, %cst_4 {dimension_numbers = #tpu.dot_dimension_numbers<[2], [2], [1], [1], [0, 0, 0, 1, 1, 1], [0], [0]>} : vector<1x8x128xf32>, vector<1x8x128xf32>, vector<1x8x8xf32> -> vector<1x8x8xf32>
    "tpu.trace_stop"() : () -> ()
    %c0_5 = arith.constant 0 : index
    %c0_6 = arith.constant 0 : index
    %11 = vector.load %arg3[%c0_5, %c0_6] : memref<8x8xf32, #tpu.memory_space<vmem>>, vector<8x8xf32>
    %12 = vector.shape_cast %11 : vector<8x8xf32> to vector<1x8x8xf32>
    %13 = arith.addf %10, %12 : vector<1x8x8xf32>
    %cst_7 = arith.constant dense<0xFF800000> : vector<1x8xf32>
    %14 = vector.multi_reduction <maximumf>, %13, %cst_7 [2] : vector<1x8x8xf32> to vector<1x8xf32>
    %15 = vector.shape_cast %14 : vector<1x8xf32> to vector<1x8x1xf32>
    %16 = vector.broadcast %15 : vector<1x8x1xf32> to vector<1x8x8xf32>
    %17 = arith.subf %13, %16 : vector<1x8x8xf32>
    %18 = math.exp %17 : vector<1x8x8xf32>
    %cst_8 = arith.constant dense<0.000000e+00> : vector<1x8xf32>
    %19 = vector.multi_reduction <add>, %18, %cst_8 [2] : vector<1x8x8xf32> to vector<1x8xf32>
    %20 = vector.shape_cast %19 : vector<1x8xf32> to vector<1x8x1xf32>
    %21 = tpu.reciprocal %20 {approx = true} : vector<1x8x1xf32> -> vector<1x8x1xf32>
    %22 = vector.broadcast %21 : vector<1x8x1xf32> to vector<1x8x8xf32>
    %23 = arith.mulf %18, %22 : vector<1x8x8xf32>
    "tpu.trace_start"() <{level = 10 : i32, message = "bqk,bkh->bqh"}> : () -> ()
    %cst_9 = arith.constant dense<0.000000e+00> : vector<1x8x128xf32>
    %24 = tpu.matmul %23, %9, %cst_9 {dimension_numbers = #tpu.dot_dimension_numbers<[2], [1], [1], [2], [0, 0, 0, 1, 1, 2], [0], [0]>} : vector<1x8x8xf32>, vector<1x8x128xf32>, vector<1x8x128xf32> -> vector<1x8x128xf32>
    "tpu.trace_stop"() : () -> ()
    %25 = vector.extract_strided_slice %24 {offsets = [0, 0, 0], sizes = [1, 8, 16], strides = [1, 1, 1]} : vector<1x8x128xf32> to vector<1x8x16xf32>
    %c0_10 = arith.constant 0 : index
    %c0_11 = arith.constant 0 : index
    %c0_12 = arith.constant 0 : index
    %26 = vector.load %arg4[%c0_10, %c0_11, %c0_12] : memref<1x8x16xf32, #tpu.memory_space<vmem>>, vector<1x8x16xf32>
    tpu.vector_store %arg4[%c0_10, %c0_11, %c0_12], %25 {strides = array<i32>} : memref<1x8x16xf32, #tpu.memory_space<vmem>>, vector<1x8x16xf32>,
    return
  }
  func.func @transform_0(%arg0: i32) -> (i32, i32, i32) {
    %c0_i32 = arith.constant 0 : i32
    %c0_i32_0 = arith.constant 0 : i32
    %c0_i32_1 = arith.constant 0 : i32
    return %arg0, %c0_i32, %c0_i32_0 : i32, i32, i32
  }
  func.func @transform_1(%arg0: i32) -> (i32, i32) {
    %c0_i32 = arith.constant 0 : i32
    %c0_i32_0 = arith.constant 0 : i32
    %c0_i32_1 = arith.constant 0 : i32
    return %c0_i32, %c0_i32_0 : i32, i32
  }
  func.func @transform_2(%arg0: i32) -> (i32, i32) {
    %c0_i32 = arith.constant 0 : i32
    %c0_i32_0 = arith.constant 0 : i32
    %c0_i32_1 = arith.constant 0 : i32
    return %c0_i32, %c0_i32_0 : i32, i32
  }
  func.func @transform_3(%arg0: i32) -> (i32, i32, i32) {
    %c0_i32 = arith.constant 0 : i32
    %c0_i32_0 = arith.constant 0 : i32
    %c0_i32_1 = arith.constant 0 : i32
    return %arg0, %c0_i32, %c0_i32_0 : i32, i32, i32
  }
}

</mosaic_0001>

<bundles_post_ra>
// kernel: tpu_custom_call.1
= control target key start
LH: loop header
LB: loop body
LE: loop exit
PB: predicated region body
PF: predicated region fallthrough
CT: control target
= control target key end

     0   :  { %8 = vsyncpa [#allocation3], 0  ;;  %s1199_s0 = inlined_call_operand.hbm [shape: f32[2,8,32], index: 0, kind: input, shape index: {}]   ;;  %s1200_s1 = inlined_call_operand.hbm [shape: f32[32,384], index: 1, kind: input, shape index: {}]   ;;  %s1201_s2 = inlined_call_operand.hbm [shape: f32[8,8], index: 2, kind: input, shape index: {}]   ;;  %s1202_s3 = inlined_call_operand.hbm [shape: f32[2,8,16], index: 3, kind: output, shape index: {}]  }
   0x1   :  { %10 = vsyncpa [#allocation3 + $0x1], 0 }
   0x2   :  { %11 = vsyncpa [#allocation6], 0 }
   0x3   :  { %12 = vsyncpa [#allocation4], 0 }
   0x4   :  { %14 = vsyncpa [#allocation4 + $0x1], 0  ;;  %s958_s12 = smov 0   ;;  %s960_s13 = smov 0  }
   0x5   :  { %s962_s14 = smov 0   ;;  %s964_s15 = smov 0  }
   0x6 LB: > { %s979_s16 = sadd.s32 4294967295, %s927_s15   ;;  %s632_s17 = sadd.s32 4294967294, %s927_s15   ;;  %s927_s15 = sphi %s964_s15, %s1222_s15   ;;  %s923_s14 = sphi %s962_s14, %s1221_s14   ;;  %s919_s13 = sphi %s960_s13, %s1220_s13   ;;  %s915_s12 = sphi %s958_s12, %s1219_s12  }
   0x7   : > { %p40_p0 = scmp.ne.s32.totalorder %s919_s13, %s915_s12  ;;  %p1203_p1 = scmp.eq.s32.totalorder %s979_s16, 0 }
   0x8   : > { %p112_p3 = scmp.eq.s32.totalorder %s632_s17, 1  ;;  %p633_p5 = scmp.ge.s32.totalorder %s927_s15, 1 }
   0x9   : > { %p988_p4 = por %p1203_p1, %p40_p0  ;;  %p119_p7 = scmp.lt.s32.totalorder %s927_s15, 3 }
   0xa   : > { %p993_p6 = por %p112_p3, %p40_p0  ;;  %s929_s21 = smov [#allocation5]  }
   0xb   : > { %s1206_s18 = scalar_select %p988_p4, 1, 0 }
   0xc   : > { %s1207_s19 = scalar_select %p993_p6, 1, 0 }
   0xd   : > { %p998_p8 = pnand %p633_p5, %p119_p7  ;;  %s131_s22 = sshll.u32 %s929_s21, 4  ;;  %s1002_s22 = int_to_ptr.vmem [resolvable:$true] %s131_s22 }
   0xe   : > { %s930_s24 = smov [#allocation7]   ;;  %s771_s28 = scalar_lea.hbm %s1200_s1, 1536 }
   0xf   : > { %p707_p9 = pneg %p998_p8  ;;  %s145_s25 = sshll.u32 %s930_s24, 4  ;;  %s1013_s25 = int_to_ptr.vmem [resolvable:$true] %s145_s25 }
  0x10   : > { %p772_p12 = scmp.ne.s32.totalorder %s1200_s1, %s771_s28  ;;  %p778_p5 = scmp.lt.u32.totalorder %s771_s28, %s1200_s1 }
  0x11   : > { %p1009_p11 = pnand %p707_p9, %p1203_p1 }
  0x13   : > { %p773_p13 = pneg %p1009_p11 }
  0x15   : > { %p774_p0 = pnand %p773_p13, %p772_p12 }
  0x17   : > { %p775_p3 = pneg %p774_p0 }
  0x19   : > { %p780_p7 = pnand %p778_p5, %p775_p3 }
  0x1b   : > { %783 = shalt.err (!%p780_p7)
}
  0x1c   : > { %s784_s6 = scalar_lea.vmem %s1002_s22, 1536  ;;  %p792_p2 = scmp.lt.s32.totalorder %s1002_s22, %s1002_s22 }
  0x1d   : > { %p785_p9 = scmp.ne.s32.totalorder %s1002_s22, %s784_s6  ;;  %p793_p12 = scmp.lt.s32.totalorder %s784_s6, %s784_s6 }
  0x1f   : > { %p787_p10 = pnand %p785_p9, %p773_p13  ;;  %p794_p0 = por %p793_p12, %p792_p2 }
  0x21   : > { %p788_p1 = pneg %p787_p10 }
  0x23   : > { %p795_p6 = pnand %p794_p0, %p788_p1 }
  0x25   : > { %798 = shalt.err (!%p795_p6)
}
  0x26   : > { %s931_s7 = smov 384   ;;  %s932_s8 = smov 24  }
  0x27   : > { %710 = dma.hbm_to_vmem [thread:$0]  (!%p1009_p11), %s1200_s1, 1536, %s1002_s22, [#allocation6], %s931_s7, %s931_s7, %s932_s8  }
  0x28   : > { %s799_s21 = scalar_lea.hbm %s1201_s2, 128 }
  0x29   : > { %p800_p2 = scmp.ne.s32.totalorder %s1201_s2, %s799_s21  ;;  %p806_p10 = scmp.lt.u32.totalorder %s799_s21, %s1201_s2 }
  0x2b   : > { %p802_p1 = pnand %p800_p2, %p773_p13 }
  0x2d   : > { %p803_p6 = pneg %p802_p1 }
  0x2f   : > { %p808_p3 = pnand %p806_p10, %p803_p6 }
  0x31   : > { %811 = shalt.err (!%p808_p3)
}
  0x32   : > { %s812_s22 = scalar_lea.vmem %s1013_s25, 128  ;;  %p820_p12 = scmp.lt.s32.totalorder %s1013_s25, %s1013_s25 }
  0x33   : > { %p813_p5 = scmp.ne.s32.totalorder %s1013_s25, %s812_s22  ;;  %p821_p0 = scmp.lt.s32.totalorder %s812_s22, %s812_s22 }
  0x35   : > { %p815_p7 = pnand %p813_p5, %p773_p13  ;;  %p822_p2 = por %p821_p0, %p820_p12 }
  0x37   : > { %p816_p9 = pneg %p815_p7 }
  0x39   : > { %p823_p1 = pnand %p822_p2, %p816_p9 }
  0x3b   : > { %826 = shalt.err (!%p823_p1)
}
  0x3c   : > { %713 = dma.hbm_to_vmem [thread:$0]  (!%p1009_p11), %s1201_s2, 128, %s1013_s25, [#allocation6]  }
  0x3d   : > { %s1068_s4 = sadd.s32 1, %s927_s15   ;;  %s27_s23 = sadd.s32 1, %s923_s14 }
  0x3e   : > { %s24_s5 = ssub.s32 %s927_s15, %s1068_s4  ;;  %p34_p13 = scmp.ne.s32.totalorder %s923_s14, %s919_s13 }
  0x3f   : > { %p25_p6 = scmp.eq.s32.totalorder %s24_s5, 0  ;;  %p35_p10 = scmp.eq.s32.totalorder %s927_s15, 0 }
  0x40   : > { %p1210_p3 = scmp.eq.s32.totalorder %s979_s16, 1  ;;  %p724_p7 = scmp.lt.s32.totalorder %s927_s15, 2 }
  0x41   : > { %s1084_s7 = scalar_select %p25_p6, %s923_s14, %s27_s23  }
  0x42   : > { %p1078_p5 = por %p1210_p3, %p34_p13  ;;  %p36_p9 = por %p35_p10, %p34_p13 }
  0x43   : > { %s156_s8 = sand.u32 1, %s923_s14   ;;  %s638_s25 = sshll.u32 %s927_s15, 7 }
  0x44   : > { %s1211_s6 = scalar_select %p1078_p5, 1, 0 }
  0x45   : > { %s637_s9 = sshll.u32 %s156_s8, 3  ;;  %s1091_s17 = scalar_lea.hbm %s1199_s0, %s638_s25 }
  0x46   : > { %s160_s21 = scalar_lea.vmem [#allocation2], %s637_s9  ;;  %p1095_p11 = pnand %p724_p7, %p36_p9 }
  0x47   : > { %s167_s24 = sshll.u32 %s160_s21, 4  ;;  %s157_s27 = scalar_lea.sflag [#allocation3], %s156_s8  ;;  %s1093_s24 = int_to_ptr.vmem [resolvable:$true] %s167_s24 }
  0x48   : > { %s827_s28 = scalar_lea.hbm %s1091_s17, 128  ;;  %p829_p0 = pneg %p1095_p11 }
  0x49   : > { %p828_p12 = scmp.ne.s32.totalorder %s1091_s17, %s827_s28  ;;  %s832_s30 = scalar_lea.hbm %s1199_s0, 256 }
  0x4a   : > { %p833_p13 = scmp.lt.u32.totalorder %s1091_s17, %s1199_s0  ;;  %p834_p6 = scmp.lt.u32.totalorder %s832_s30, %s827_s28 }
  0x4b   : > { %p830_p2 = pnand %p829_p0, %p828_p12  ;;  %p836_p3 = scmp.lt.u32.totalorder %s827_s28, %s1091_s17 }
  0x4c   : > { %p835_p10 = por %p834_p6, %p833_p13 }
  0x4d   : > { %p831_p1 = pneg %p830_p2 }
  0x4e   : > { %p837_p7 = por %p836_p3, %p835_p10 }
  0x50   : > { %p838_p9 = pnand %p837_p7, %p831_p1 }
  0x52   : > { %841 = shalt.err (!%p838_p9)
}
  0x53   : > { %s842_s8 = scalar_lea.vmem %s1093_s24, 128  ;;  %s933_s9 = smov [#allocation2]  }
  0x54   : > { %p843_p12 = scmp.ne.s32.totalorder %s1093_s24, %s842_s8  ;;  %s847_s25 = sshll.u32 %s933_s9, 4  ;;  %s848_s25 = int_to_ptr.vmem [resolvable:$false] %s847_s25 }
  0x55   : > { %s849_s10 = scalar_lea.vmem %s848_s25, 256  ;;  %p850_p4 = scmp.lt.s32.totalorder %s1093_s24, %s848_s25 }
  0x56   : > { %p845_p2 = pnand %p843_p12, %p829_p0  ;;  %p851_p13 = scmp.lt.s32.totalorder %s849_s10, %s842_s8 }
  0x58   : > { %p846_p5 = pneg %p845_p2  ;;  %p852_p6 = por %p851_p13, %p850_p4 }
  0x5a   : > { %p853_p10 = pnand %p852_p6, %p846_p5 }
  0x5c   : > { %856 = shalt.err (!%p853_p10)
}
  0x5d   : > { %717 = dma.hbm_to_vmem [thread:$0]  (!%p1095_p11), %s1091_s17, 128, %s1093_s24, %s157_s27  }
  0x5e   : > { %176 = sbr.rel (%p998_p8) target bundleno = 1086 (0x43e), region = 32  ;;  %s1127_s11 = sand.u32 (!%p998_p8), 1, %s919_s13  }
  0x5f   : > { %s640_s21 = sshll.u32 (!%p998_p8), %s1127_s11, 3  ;;  %s179_s28 = scalar_lea.sflag (!%p998_p8), [#allocation3], %s1127_s11 }
  0x60   : > { %s182_s22 = scalar_lea.vmem (!%p998_p8), [#allocation2], %s640_s21  ;;  %p1213_p4 = scmp.ne.s32.totalorder (!%p998_p8), %s1206_s18, 0 }
  0x65   : > { %902 = dma.done.wait (%p1213_p4), %s179_s28, 128  }
  0x66   : > { %904 = vsyncadd (%p1213_p4), %s179_s28, 4294967168  ;;  %p1214_p5 = scmp.eq.s32.totalorder %s979_s16, 0 }
  0x68   : > { %906 = dma.done.wait (%p1214_p5), [#allocation6], 1664   ;;  %p1215_p8 = pmov %p1214_p5 }
  0x69   : > { %v934_v0 = vmov 0.0   ;;  %v215_v1 = vld [vmem:[#allocation5 + $0x8] sm:$0xff]  ;;  %v218_v2 = vld [vmem:[#allocation5 + $0x20] sm:$0xff]  ;;  %v217_v5 = vld [vmem:[#allocation5 + $0x18] sm:$0xff]  ;;  %vm226_vm0 = vcmask 261120   ;;  %vm935_vm1 = vmmov 0  }
  0x6a   : > { %908 = vsyncadd (%p1215_p8), [#allocation6], 4294965632  ;;  %294 = vmatprep.mubr.f32.mxu0 %v934_v0  ;;  %v214_v3 = vld [vmem:[#allocation5] sm:$0xff]  ;;  %v681_v4 = vpack.c.bf16 %v218_v2, %v215_v1  ;;  %v221_v6 = vld [vmem:[#allocation5 + $0x38] sm:$0xff]  ;;  %668 = vmatprep.mubr.msk.f32.mxu1 %vm935_vm1, %v934_v0  ;;  %v936_v19 = vmov 0.0|0.0   ;;  %vm442_vm2 = vcmask 64512  }
  0x6b   : > { %v224_v7 = vld [vmem:[#allocation5 + $0x50] sm:$0xff]  ;;  %v683_v8 = vpack.c.bf16 %v217_v5, %v214_v3  ;;  %v223_v11 = vld [vmem:[#allocation5 + $0x48] sm:$0xff]  ;;  %v222_v18 = vld [vmem:[#allocation5 + $0x40] sm:$0xff]  ;;  %689 = vmatprep.subr.bf16.mxu1 %v936_v19  ;;  %s648_s18 = sshll.u32 %s979_s16, 7  ;;  %s212_s20 = scalar_lea.vmem [#allocation8], %s640_s21  ;;  %vm527_vm3 = vcmask 130048  }
  0x6c   : > { %v685_v9 = vpack.c.bf16 %v224_v7, %v221_v6  ;;  %v220_v10 = vld [vmem:[#allocation5 + $0x30] sm:$0xff]  ;;  %682 = vmatprep.subr.bf16.mxu0 %v681_v4  ;;  %v219_v17 = vld [vmem:[#allocation5 + $0x28] sm:$0xff]  ;;  %v225_v21 = vld [vmem:[#allocation5 + $0x58] sm:$0xff]  ;;  %s543_s17 = sshll.u32 %s212_s20, 4  ;;  %s1155_s27 = scalar_lea.hbm %s1202_s3, %s648_s18  ;;  %s1157_s17 = int_to_ptr.vmem [resolvable:$true] %s543_s17 }
  0x6d   : > { %684 = vmatpush1.bf16.msra.mxu0 %v683_v8  ;;  %v687_v12 = vpack.c.bf16 %v223_v11, %v220_v10  ;;  %v213_v13 = vld [vmem:[%s182_s22] sm:$0xff]  ;;  %v693_v22 = vpack.c.bf16 %v225_v21, %v222_v18  ;;  %v371_v23 = vld [vmem:[#allocation7] sm:$0xff]  ;;  %s530_s29 = scalar_lea.sflag [#allocation4], %s1127_s11  ;;  %s857_s30 = scalar_lea.vmem %s1157_s17, 128 }
  0x6e   : > { %686 = vmatprep.subr.bf16.mxu0 %v685_v9  ;;  %v216_v16 = vld [vmem:[#allocation5 + $0x10] sm:$0xff]  ;;  %p858_p11 = scmp.ne.s32.totalorder %s1157_s17, %s857_s30  ;;  %p1216_p0 = scmp.ne.s32.totalorder %s1211_s6, 0 }
  0x6f   : > { %v690_v20 = vpack.c.bf16 %v219_v17, %v216_v16  ;;  %s937_s16 = smov [#allocation8]  }
  0x70   : > { %p859_p1 = pnand %p858_p11, %p1216_p0  ;;  %s861_s23 = sshll.u32 %s937_s16, 4  ;;  %s862_s23 = int_to_ptr.vmem [resolvable:$false] %s861_s23 }
  0x71   : > { %688 = vmatpush1.bf16.msra.mxu0 %v687_v12  ;;  %691 = vmatpush3.bf16.msra.mxu1 %v690_v20  ;;  %s863_s5 = scalar_lea.vmem %s862_s23, 256  ;;  %p864_p7 = scmp.lt.s32.totalorder %s1157_s17, %s862_s23 }
  0x72   : > { %671 = vmatprep.subr.mxu0 %v934_v0  ;;  %692 = vmatprep.subr.bf16.mxu1 %v936_v19  ;;  %p860_p3 = pneg %p859_p1  ;;  %p865_p9 = scmp.lt.s32.totalorder %s863_s5, %s857_s30 }
  0x74   : > { %644 = vmatmul.mubr.msk.f32.vlgmr.msra.gmra.mrb[0].mxu0 %vm226_vm0, %v213_v13  ;;  %p866_p12 = por %p865_p9, %p864_p7 }
  0x75   : > { %673 = vmatprep.mubr.msk.f32.mxu0 %vm935_vm1, %v934_v0  ;;  %694 = vmatpush3.bf16.msra.mxu1 %v693_v22 }
  0x76   : > { %676 = vmatprep.subr.mxu1 %v934_v0  ;;  %p867_p2 = pnand %p866_p12, %p860_p3 }
  0x78   : > { %669 = vmatmul.mubr.msk.f32.vlgmr.msra.gmra.mrb[0].mxu1 %vm226_vm0, %v213_v13 }
  0x79   : > { %678 = vmatprep.mubr.msk.f32.mxu1 %vm935_vm1, %v934_v0 }
 0x147   : > { %v296_v14 = vpop.f32.mrb[0].mxu0 }
 0x148   : > { %v298_v15 = vpop.f32.mrb[1].mxu0 }
 0x149   : > { %672 = vmatpush3.xpose.msra.mxu0 %v298_v15 }
 0x14b   : > { %v367_v33 = vpop.f32.mrb[0].mxu1 }
 0x14c   : > { %674 = vmatmul.mubr.f32.vlgmr.msra.gmra.mrb[2].mxu0 %v296_v14  ;;  %v670_v34 = vpop.f32.mrb[1].mxu1  ;;  %677 = vmatpush3.msra.mxu1 %v367_v33 }
 0x21f   : > { %v438_v24 = vpop.f32.mrb[2].mxu0 }
 0x220   : > { %v439_v25 = vadd.f32 %v438_v24, %v371_v23  ;;  %v675_v26 = vpop.f32.mrb[3].mxu0 }
 0x222   : > { %v443_v27 = vsel %vm442_vm2, %v439_v25, -inf }
 0x223   : > { %444 = vmax.xlane.f32.xlu0 %v443_v27 }
 0x2b0   : > { %v445_v28 = vpop.xlane.xlu0 %444 }
 0x2b1   : > { %v446_v29 = vsub.f32 %v439_v25, %v445_v28 }
 0x2b3   : > { %v447_v30 = vmul.f32 1.442695, %v446_v29 }
 0x2b5   : > { %767 = vpow2.f32 %v447_v30 }
 0x2bf   : > { %v768_v31 = vpop.eup %767 }
 0x2c0   : > { %v449_v32 = vsel %vm442_vm2, %v768_v31, 0.0 }
 0x2c1   : > { %450 = vadd.xlane.f32.xlu0 %v449_v32 }
 0x34e   : > { %v451_v35 = vpop.xlane.xlu0 %450 }
 0x34f   : > { %769 = vrcp.f32 %v451_v35 }
 0x359   : > { %v770_v36 = vpop.eup %769 }
 0x35a   : > { %v453_v37 = vmul.f32 %v770_v36, %v768_v31 }
 0x35c   : > { %679 = vmatmul.mubr.msk.f32.vlgmr.msra.gmra.mrb[2].mxu1 %vm442_vm2, %v453_v37 }
 0x42f   : > { %v523_v38 = vpop.f32.mrb[2].mxu1 }
 0x430   : > { %528 = vst.msk [vmem:[%s212_s20] sm:$0xff] %vm527_vm3, %v523_v38  ;;  %v680_v39 = vpop.f32.mrb[3].mxu1 }
 0x431   : > { %870 = shalt.err (!%p867_p2)
}
 0x432   : > { %s871_s8 = scalar_lea.hbm %s1155_s27, 128  ;;  %s875_s10 = scalar_lea.hbm %s1202_s3, 256 }
 0x433   : > { %p872_p13 = scmp.ne.s32.totalorder %s1155_s27, %s871_s8  ;;  %p876_p4 = scmp.lt.u32.totalorder %s1155_s27, %s1202_s3 }
 0x434   : > { %p877_p5 = scmp.lt.u32.totalorder %s875_s10, %s871_s8  ;;  %p879_p11 = scmp.lt.u32.totalorder %s871_s8, %s1155_s27 }
 0x435   : > { %p873_p6 = pnand %p872_p13, %p1216_p0 }
 0x436   : > { %p878_p8 = por %p877_p5, %p876_p4 }
 0x437   : > { %p874_p10 = pneg %p873_p6 }
 0x438   : > { %p880_p1 = por %p879_p11, %p878_p8 }
 0x43a   : > { %p881_p3 = pnand %p880_p1, %p874_p10 }
 0x43c   : > { %884 = shalt.err (!%p881_p3)
}
 0x43d   : > { %705 = dma.vmem_to_hbm [thread:$0]  (%p1216_p0), %s1157_s17, 128, %s1155_s27, %s530_s29  }
 0x43e PF: > { %s555_s28 = sand.u32 1, %s915_s12   ;;  %p1217_p7 = scmp.ne.s32.totalorder %s1207_s19, 0 }
 0x43f   : > { %p1218_p9 = scmp.ge.s32.totalorder %s927_s15, 2  ;;  %s556_s22 = scalar_lea.sflag [#allocation4], %s555_s28 }
 0x441   : > { %p719_p12 = pnand %p1218_p9, %p1217_p7 }
 0x443   : > { %910 = dma.done.wait (!%p719_p12), %s556_s22, 128  }
 0x444   : > { %912 = vsyncadd (!%p719_p12), %s556_s22, 4294967168  ;;  %p17_p2 = scmp.ge.s32.totalorder %s1068_s4, 4   ;;  %s1219_s12 = smov %s919_s13 }
 0x445   : > { %s1220_s13 = smov %s923_s14  ;;  %s1221_s14 = smov %s1084_s7 }
 0x446   : > { %s1222_s15 = smov %s1068_s4  ;;  %19 = sbr.rel (!%p17_p2) target bundleno = 6 (0x6), region = 85 }
 0x44d   :  { %561 = vsyncpa [#allocation3], 1 }
 0x44e   :  { %563 = vsyncpa [#allocation3 + $0x1], 1 }
 0x44f   :  { %564 = vsyncpa [#allocation6], 1 }
 0x450   :  { %565 = vsyncpa [#allocation4], 1 }
 0x451   :  { %567 = vsyncpa [#allocation4 + $0x1], 1 }

</bundles_post_ra>
